<compile_context>
chip_gen: v7x
topology: tpu7x:2x2x1
jax: 0.10.0
libtpu: 0.0.40
codegen_flags: <defaults>
</compile_context>

<pallas_src>
import jax
import jax.numpy as jnp
from jax.experimental import pallas as pl
from jax.experimental.pallas import tpu as pltpu

# Dimensions implied by the module globals.
THRESH_LENS = [2, 11, 5, 5]
NUM_ARMS = 3
NUM_STRATA = sum(THRESH_LENS)                  # 23
LEN_STATE = NUM_STRATA * NUM_ARMS              # 69
LEN_EXT_STATE = LEN_STATE + NUM_STRATA         # 92
HIDDEN = 256


def _round_up(n, m):
    return ((n + m - 1) // m) * m


def critic_kernel(x_ref, w1_ref, b1_ref, w2_ref, b2_ref, v_ref):
    # Layer 1 on the MXU (f32 accumulate regardless of input dtype).
    h = jnp.dot(x_ref[...], w1_ref[...], preferred_element_type=jnp.float32)
    h = jnp.maximum(h + b1_ref[...], 0.0)                     # (TILE_B, 256)
    # Layer 2 (N=1): VPU multiply + lane reduce instead of a second MXU pass.
    v = jnp.sum(h * w2_ref[...], axis=-1, keepdims=True)      # (TILE_B, 1)
    v_ref[...] = (v + b2_ref[0]).astype(v_ref.dtype)


def critic_forward(x, w1, b1, w2, b2, *, tile_b=1024, use_bf16=False):
    """x: (B, 92) f32; w1: (92,256); b1: (1,256); w2: (256,1); b2: (1,1).

    Returns (B,) f32 — matches torch `.squeeze()` for B > 1.
    """
    B, F = x.shape
    assert F == LEN_EXT_STATE and w1.shape == (LEN_EXT_STATE, HIDDEN)

    # Batch tile: multiple of 8 sublanes, capped so tiny batches stay one tile.
    tile_b = max(8, min(_round_up(tile_b, 8), _round_up(B, 8)))
    b_pad = _round_up(B, tile_b)
    if b_pad != B:
        x = jnp.pad(x, ((0, b_pad - B), (0, 0)))

    if use_bf16:
        # Mem-roofline option: halves x's HBM bytes and runs the MXU at bf16
        # rate; the contraction still accumulates in f32 inside the kernel.
        x = x.astype(jnp.bfloat16)
        w1 = w1.astype(jnp.bfloat16)

    w2_row = jnp.reshape(w2, (1, HIDDEN)).astype(jnp.float32)   # (1, 256)
    b2_scalar = jnp.reshape(b2, (1,)).astype(jnp.float32)       # SMEM scalar

    grid = (b_pad // tile_b,)
    out = pl.pallas_call(
        critic_kernel,
        out_shape=jax.ShapeDtypeStruct((b_pad, 1), jnp.float32),
        grid_spec=pltpu.PrefetchScalarGridSpec(
            num_scalar_prefetch=0,
            grid=grid,
            in_specs=[
                pl.BlockSpec((tile_b, LEN_EXT_STATE), lambda i: (i, 0)),   # x
                pl.BlockSpec((LEN_EXT_STATE, HIDDEN), lambda i: (0, 0)),   # w1
                pl.BlockSpec((1, HIDDEN), lambda i: (0, 0)),               # b1
                pl.BlockSpec((1, HIDDEN), lambda i: (0, 0)),               # w2^T
                pl.BlockSpec(memory_space=pltpu.MemorySpace.SMEM),         # b2
            ],
            out_specs=pl.BlockSpec((tile_b, 1), lambda i: (i, 0)),
        ),
        compiler_params=pltpu.CompilerParams(
            # batch tiles are independent -> shard across TCs on v7x
            dimension_semantics=("parallel",)),
    )(x, w1, b1, w2_row, b2_scalar)

    # PyTorch .squeeze(): (B, 1) -> (B,)  (glue outside the kernel)
    return jnp.squeeze(out[:B], axis=-1)


def critic_ref(x, w1, b1, w2, b2):
    return jnp.squeeze(jnp.maximum(x @ w1 + b1, 0.0) @ w2 + b2, axis=-1)


def init_params(key):
    """Deterministic synthetic parameters with nn.Linear-like scaling."""
    k1, k2, k3, k4 = jax.random.split(key, 4)
    bound1 = 1.0 / jnp.sqrt(LEN_EXT_STATE)
    bound2 = 1.0 / jnp.sqrt(HIDDEN)
    w1 = jax.random.uniform(k1, (LEN_EXT_STATE, HIDDEN), jnp.float32,
                            -bound1, bound1)
    b1 = jax.random.uniform(k2, (1, HIDDEN), jnp.float32, -bound1, bound1)
    w2 = jax.random.uniform(k3, (HIDDEN, 1), jnp.float32, -bound2, bound2)
    b2 = jax.random.uniform(k4, (1, 1), jnp.float32, -bound2, bound2)
    return w1, b1, w2, b2


if __name__ == "__main__":
    key = jax.random.PRNGKey(0)
    kx, kp, kx2 = jax.random.split(key, 3)
    w1, b1, w2, b2 = init_params(kp)

    # 1) Tiny batch (as in the RL loop) -- exact f32 path, single tile.
    B = 8
    x = jax.random.normal(kx, (B, LEN_EXT_STATE), jnp.float32)
    v = jax.block_until_ready(critic_forward(x, w1, b1, w2, b2))
    ref = critic_ref(x, w1, b1, w2, b2)
    assert v.shape == (B,)
    assert jnp.allclose(v, ref, atol=1e-4, rtol=1e-4)

    # 2) Non-multiple batch: exercises batch tiling + tail padding (grid > 1).
    B2 = 200
    x2 = jax.random.normal(kx2, (B2, LEN_EXT_STATE), jnp.float32)
    v2 = jax.block_until_ready(critic_forward(x2, w1, b1, w2, b2, tile_b=128))
    ref2 = critic_ref(x2, w1, b1, w2, b2)
    assert v2.shape == (B2,)
    assert jnp.allclose(v2, ref2, atol=1e-4, rtol=1e-4)

    # 3) bf16-activation roofline path (f32 accumulate), loose tolerance.
    v3 = jax.block_until_ready(
        critic_forward(x2, w1, b1, w2, b2, tile_b=128, use_bf16=True))
    assert jnp.allclose(v3, ref2, atol=1e-1, rtol=5e-2)

    print("KERNEL_OK")
</pallas_src>

<mosaic_0001>
module attributes {stable_mosaic.version = 11 : i64} {
  func.func @critic_kernel(%arg0: i32, %arg1: memref<8x92xf32, #tpu.memory_space<vmem>>, %arg2: memref<92x256xf32, #tpu.memory_space<vmem>>, %arg3: memref<1x256xf32, #tpu.memory_space<vmem>>, %arg4: memref<1x256xf32, #tpu.memory_space<vmem>>, %arg5: memref<1xf32, #tpu.memory_space<smem>>, %arg6: memref<8x1xf32, #tpu.memory_space<vmem>>) attributes {dimension_semantics = [#tpu.dimension_semantics<parallel>], iteration_bounds = array<i64: 1>, scalar_prefetch = 0 : i64, scratch_operands = 0 : i64, tpu.core_type = #tpu.core_type<tc>, window_params = [{transform_indices = @transform_0, window_bounds = array<i64: 8, 92>}, {pipeline_mode = #tpu.pipeline_mode<synchronous>, transform_indices = @transform_1, window_bounds = array<i64: 92, 256>}, {pipeline_mode = #tpu.pipeline_mode<synchronous>, transform_indices = @transform_2, window_bounds = array<i64: 1, 256>}, {pipeline_mode = #tpu.pipeline_mode<synchronous>, transform_indices = @transform_3, window_bounds = array<i64: 1, 256>}, {transform_indices = @transform_4, window_bounds = array<i64: 1>}, {transform_indices = @transform_5, window_bounds = array<i64: 8, 1>}]} {
    %c0 = arith.constant 0 : index
    %c0_0 = arith.constant 0 : index
    %0 = vector.load %arg1[%c0, %c0_0] : memref<8x92xf32, #tpu.memory_space<vmem>>, vector<8x92xf32>
    %c0_1 = arith.constant 0 : index
    %c0_2 = arith.constant 0 : index
    %1 = vector.load %arg2[%c0_1, %c0_2] : memref<92x256xf32, #tpu.memory_space<vmem>>, vector<92x256xf32>
    %cst = arith.constant dense<0.000000e+00> : vector<8x256xf32>
    %2 = tpu.matmul %0, %1, %cst {dimension_numbers = #tpu.dot_dimension_numbers<[1], [0], [0], [1], [0, 0, 1, 1], [], []>} : vector<8x92xf32>, vector<92x256xf32>, vector<8x256xf32> -> vector<8x256xf32>
    %c0_3 = arith.constant 0 : index
    %c0_4 = arith.constant 0 : index
    %3 = vector.load %arg3[%c0_3, %c0_4] : memref<1x256xf32, #tpu.memory_space<vmem>>, vector<1x256xf32>
    %4 = vector.broadcast %3 : vector<1x256xf32> to vector<8x256xf32>
    %5 = arith.addf %2, %4 : vector<8x256xf32>
    %cst_5 = arith.constant 0.000000e+00 : f32
    %6 = vector.broadcast %cst_5 : f32 to vector<8x256xf32>
    %7 = arith.maximumf %5, %6 : vector<8x256xf32>
    %c0_6 = arith.constant 0 : index
    %c0_7 = arith.constant 0 : index
    %8 = vector.load %arg4[%c0_6, %c0_7] : memref<1x256xf32, #tpu.memory_space<vmem>>, vector<1x256xf32>
    %9 = vector.broadcast %8 : vector<1x256xf32> to vector<8x256xf32>
    %10 = arith.mulf %7, %9 : vector<8x256xf32>
    %cst_8 = arith.constant dense<0.000000e+00> : vector<8xf32>
    %11 = vector.multi_reduction <add>, %10, %cst_8 [1] : vector<8x256xf32> to vector<8xf32>
    %12 = vector.shape_cast %11 : vector<8xf32> to vector<8x1xf32>
    %c0_9 = arith.constant 0 : index
    %13 = memref.load %arg5[%c0_9] : memref<1xf32, #tpu.memory_space<smem>>
    %14 = vector.broadcast %13 : f32 to vector<8x1xf32>
    %15 = arith.addf %12, %14 : vector<8x1xf32>
    %c0_10 = arith.constant 0 : index
    %c0_11 = arith.constant 0 : index
    %16 = vector.load %arg6[%c0_10, %c0_11] : memref<8x1xf32, #tpu.memory_space<vmem>>, vector<8x1xf32>
    tpu.vector_store %arg6[%c0_10, %c0_11], %15 {strides = array<i32>} : memref<8x1xf32, #tpu.memory_space<vmem>>, vector<8x1xf32>,
    return
  }
  func.func @transform_0(%arg0: i32) -> (i32, i32) {
    %c0_i32 = arith.constant 0 : i32
    %c0_i32_0 = arith.constant 0 : i32
    return %arg0, %c0_i32 : i32, i32
  }
  func.func @transform_1(%arg0: i32) -> (i32, i32) {
    %c0_i32 = arith.constant 0 : i32
    %c0_i32_0 = arith.constant 0 : i32
    %c0_i32_1 = arith.constant 0 : i32
    return %c0_i32, %c0_i32_0 : i32, i32
  }
  func.func @transform_2(%arg0: i32) -> (i32, i32) {
    %c0_i32 = arith.constant 0 : i32
    %c0_i32_0 = arith.constant 0 : i32
    %c0_i32_1 = arith.constant 0 : i32
    return %c0_i32, %c0_i32_0 : i32, i32
  }
  func.func @transform_3(%arg0: i32) -> (i32, i32) {
    %c0_i32 = arith.constant 0 : i32
    %c0_i32_0 = arith.constant 0 : i32
    %c0_i32_1 = arith.constant 0 : i32
    return %c0_i32, %c0_i32_0 : i32, i32
  }
  func.func @transform_4(%arg0: i32) -> i32 {
    %c0_i32 = arith.constant 0 : i32
    %c0_i32_0 = arith.constant 0 : i32
    return %c0_i32 : i32
  }
  func.func @transform_5(%arg0: i32) -> (i32, i32) {
    %c0_i32 = arith.constant 0 : i32
    %c0_i32_0 = arith.constant 0 : i32
    return %arg0, %c0_i32 : i32, i32
  }
}

</mosaic_0001>

<bundles_post_ra>
// kernel: tpu_custom_call.1
= control target key start
LH: loop header
LB: loop body
LE: loop exit
PB: predicated region body
PF: predicated region fallthrough
CT: control target
= control target key end

     0   :  { %11 = vsyncpa [#allocation4], 0  ;;  %s358_s0 = inlined_call_operand.hbm [shape: f32[8,92], index: 0, kind: input, shape index: {}]   ;;  %s359_s1 = inlined_call_operand.hbm [shape: f32[92,256], index: 1, kind: input, shape index: {}]   ;;  %s360_s2 = inlined_call_operand.vmem [shape: f32[1,256], index: 2, kind: input, shape index: {}]   ;;  %s361_s3 = inlined_call_operand.vmem [shape: f32[1,256], index: 3, kind: input, shape index: {}]   ;;  %s362_s4 = inlined_call_operand.<no memory space> [shape: f32[1], index: 4, kind: input, shape index: {}]   ;;  %s363_s5 = inlined_call_operand.vmem [shape: f32[8,1], index: 5, kind: output, shape index: {}]  }
   0x1   :  { %12 = vsyncpa [#allocation6], 0  ;;  %s279_s18 = smov [#allocation3]   ;;  %s280_s20 = smov [#allocation5]  }
   0x2   :  { %s19_s19 = sshll.u32 %s279_s18, 4  ;;  %s28_s21 = sshll.u32 %s280_s20, 4  ;;  %s20_s19 = int_to_ptr.vmem [resolvable:$true] %s19_s19  ;;  %s315_s21 = int_to_ptr.vmem [resolvable:$true] %s28_s21 }
   0x3   :  { %s231_s24 = scalar_lea.hbm %s358_s0, 128 }
   0x4   :  { %p232_p0 = scmp.ne.s32.totalorder %s358_s0, %s231_s24  ;;  %p235_p1 = scmp.lt.u32.totalorder %s231_s24, %s358_s0 }
   0x6   :  { %p237_p2 = pnand %p235_p1, %p232_p0 }
   0x8   :  { %240 = shalt.err (!%p237_p2)
}
   0x9   :  { %s241_s29 = scalar_lea.vmem %s20_s19, 128  ;;  %p246_p4 = scmp.lt.s32.totalorder %s20_s19, %s20_s19 }
   0xa   :  { %p242_p3 = scmp.ne.s32.totalorder %s20_s19, %s241_s29  ;;  %p247_p5 = scmp.lt.s32.totalorder %s241_s29, %s241_s29 }
   0xc   :  { %p248_p6 = por %p247_p5, %p246_p4 }
   0xe   :  { %p249_p7 = pnand %p248_p6, %p242_p3 }
  0x10   :  { %252 = shalt.err (!%p249_p7)
}
  0x11   :  { %22 = dma.hbm_to_vmem [thread:$0]  %s358_s0, 128, %s20_s19, [#allocation4]  }
  0x12   :  { %s253_s9 = scalar_lea.hbm %s359_s1, 3072 }
  0x13   :  { %p254_p8 = scmp.ne.s32.totalorder %s359_s1, %s253_s9  ;;  %p257_p9 = scmp.lt.u32.totalorder %s253_s9, %s359_s1 }
  0x15   :  { %p259_p10 = pnand %p257_p9, %p254_p8 }
  0x17   :  { %262 = shalt.err (!%p259_p10)
}
  0x18   :  { %s263_s14 = scalar_lea.vmem %s315_s21, 3072  ;;  %p268_p12 = scmp.lt.s32.totalorder %s315_s21, %s315_s21 }
  0x19   :  { %p264_p11 = scmp.ne.s32.totalorder %s315_s21, %s263_s14  ;;  %p269_p13 = scmp.lt.s32.totalorder %s263_s14, %s263_s14 }
  0x1b   :  { %p270_p0 = por %p269_p13, %p268_p12 }
  0x1d   :  { %p271_p1 = pnand %p270_p0, %p264_p11 }
  0x1f   :  { %274 = shalt.err (!%p271_p1)
}
  0x20   :  { %s281_s0 = smov 256   ;;  %s282_s15 = smov 16  }
  0x21   :  { %34 = dma.hbm_to_vmem [thread:$0]  %s359_s1, 3072, %s315_s21, [#allocation6], %s281_s0, %s281_s0, %s282_s15  }
  0x22   :  { %275 = dma.done.wait [#allocation4], 128  }
  0x23   :  { %276 = vsyncadd [#allocation4], 4294967168 }
  0x24   :  { %277 = dma.done.wait [#allocation6], 3072  }
  0x25   :  { %278 = vsyncadd [#allocation6], 4294964224  ;;  %v283_v0 = vmov 0.0   ;;  %v49_v1 = vld [vmem:[#allocation5 + $0x8] sm:$0xff]  ;;  %v51_v2 = vld [vmem:[#allocation5 + $0x18] sm:$0xff]  ;;  %vm88_vm0 = vcmask 1043456   ;;  %v74_v38 = vlaneseq  ;;  %v186_v57 = vstv %s362_s4 }
  0x26   :  { %159 = vmatprep.mubr.f32.mxu0 %v283_v0  ;;  %v48_v3 = vld [vmem:[#allocation5] sm:$0xff]  ;;  %v199_v4 = vpack.c.bf16 %v51_v2, %v49_v1  ;;  %v50_v5 = vld [vmem:[#allocation5 + $0x10] sm:$0xff]  ;;  %v53_v6 = vld [vmem:[#allocation5 + $0x28] sm:$0xff]  ;;  %vm284_vm1 = vmmov 1   ;;  %vm84_vm3 = vcmask 752640   ;;  %vm188_vm4 = vcmask 7168  }
  0x27   :  { %v55_v7 = vld [vmem:[#allocation5 + $0x38] sm:$0xff]  ;;  %v201_v8 = vpack.c.bf16 %v50_v5, %v48_v3  ;;  %v52_v10 = vld [vmem:[#allocation5 + $0x20] sm:$0xff]  ;;  %v54_v11 = vld [vmem:[#allocation5 + $0x30] sm:$0xff]  ;;  %v75_v39 = vshrl.u32 %v74_v38, 7 }
  0x28   :  { %v203_v9 = vpack.c.bf16 %v55_v7, %v53_v6  ;;  %v57_v12 = vld [vmem:[#allocation5 + $0x48] sm:$0xff]  ;;  %200 = vmatprep.subr.bf16.mxu0 %v199_v4  ;;  %v59_v13 = vld [vmem:[#allocation5 + $0x58] sm:$0xff]  ;;  %v205_v14 = vpack.c.bf16 %v54_v11, %v52_v10  ;;  %v56_v16 = vld [vmem:[#allocation5 + $0x40] sm:$0xff] }
  0x29   :  { %202 = vmatpush1.bf16.msra.mxu0 %v201_v8  ;;  %v207_v15 = vpack.c.bf16 %v59_v13, %v57_v12  ;;  %v58_v17 = vld [vmem:[#allocation5 + $0x50] sm:$0xff]  ;;  %v61_v18 = vld [vmem:[#allocation5 + $0x68] sm:$0xff]  ;;  %v63_v19 = vld [vmem:[#allocation5 + $0x78] sm:$0xff]  ;;  %v76_v40 = vsub.s32 0, %v75_v39  ;;  %v80_v42 = vsub.s32 1, %v75_v39 }
  0x2a   :  { %204 = vmatprep.subr.bf16.mxu0 %v203_v9  ;;  %v209_v20 = vpack.c.bf16 %v58_v17, %v56_v16  ;;  %v211_v21 = vpack.c.bf16 %v63_v19, %v61_v18  ;;  %v60_v22 = vld [vmem:[#allocation5 + $0x60] sm:$0xff]  ;;  %v62_v23 = vld [vmem:[#allocation5 + $0x70] sm:$0xff]  ;;  %v65_v24 = vld [vmem:[#allocation5 + $0x88] sm:$0xff] }
  0x2b   :  { %v67_v25 = vld [vmem:[#allocation5 + $0x98] sm:$0xff]  ;;  %v213_v26 = vpack.c.bf16 %v62_v23, %v60_v22  ;;  %v64_v28 = vld [vmem:[#allocation5 + $0x80] sm:$0xff]  ;;  %v66_v29 = vld [vmem:[#allocation5 + $0x90] sm:$0xff] }
  0x2c   :  { %v215_v27 = vpack.c.bf16 %v67_v25, %v65_v24  ;;  %v69_v30 = vld [vmem:[#allocation5 + $0xa8] sm:$0xff]  ;;  %v71_v31 = vld [vmem:[#allocation5 + $0xb8] sm:$0xf]  ;;  %v217_v32 = vpack.c.bf16 %v66_v29, %v64_v28  ;;  %v68_v34 = vld [vmem:[#allocation5 + $0xa0] sm:$0xff] }
  0x2d   :  { %206 = vmatpush1.bf16.msra.mxu0 %v205_v14  ;;  %v219_v33 = vpack.c.bf16 %v71_v31, %v69_v30  ;;  %v70_v35 = vld [vmem:[#allocation5 + $0xb0] sm:$0xf]  ;;  %vm220_vm2 = vmpackc.low %vm88_vm0, %vm284_vm1  ;;  %v47_v37 = vld [vmem:[#allocation3] sm:$0xff] }
  0x2e   :  { %208 = vmatprep.subr.bf16.mxu0 %v207_v15  ;;  %v222_v36 = vpack.c.bf16 %v70_v35, %v68_v34  ;;  %v72_v41 = vld [vmem:[%s360_s2] sm:$0x3] }
  0x2f   :  { %v77_v43 = vrot.slane %v72_v41, %v76_v40  ;;  %v81_v44 = vrot.slane %v72_v41, %v80_v42  ;;  %v168_v45 = vld [vmem:[%s361_s3] sm:$0x3] }
  0x30   :  { %v173_v49 = vrot.slane %v168_v45, %v76_v40  ;;  %v177_v51 = vrot.slane %v168_v45, %v80_v42 }
  0x31   :  { %210 = vmatpush1.bf16.msra.mxu0 %v209_v20 }
  0x32   :  { %212 = vmatprep.subr.bf16.mxu0 %v211_v21 }
  0x35   :  { %214 = vmatpush1.bf16.msra.mxu0 %v213_v26 }
  0x36   :  { %216 = vmatprep.subr.bf16.mxu0 %v215_v27 }
  0x39   :  { %218 = vmatpush1.bf16.msra.mxu0 %v217_v32 }
  0x3a   :  { %221 = vmatprep.subr.msk.bf16.mxu0 %vm220_vm2, %v219_v33 }
  0x3d   :  { %224 = vmatpush1.bf16.msk.msra.mxu0 %vm220_vm2, %v222_v36 }
  0x40   :  { %198 = vmatmul.mubr.msk.f32.vlgmr.msra.gmra.mrb[0].mxu0 %vm84_vm3, %v47_v37 }
 0x113   :  { %v161_v46 = vpop.f32.mrb[0].mxu0 }
 0x114   :  { %v162_v47 = vadd.f32 %v161_v46, %v77_v43  ;;  %v163_v48 = vpop.f32.mrb[1].mxu0 }
 0x115   :  { %v164_v50 = vadd.f32 %v163_v48, %v81_v44 }
 0x116   :  { %v166_v52 = vmax.f32 %v162_v47, 0.0 }
 0x117   :  { %v167_v53 = vmax.f32 %v164_v50, 0.0 }
 0x118   :  { %v180_v54 = vmul.f32 %v173_v49, %v166_v52 }
 0x119   :  { %v181_v55 = vmul.f32 %v177_v51, %v167_v53 }
 0x11b   :  { %v182_v56 = vadd.f32 %v181_v55, %v180_v54 }
 0x11d   :  { %183 = vadd.xlane.f32.xlu0 %v182_v56 }
 0x1aa   :  { %v184_v58 = vpop.xlane.xlu0 %183 }
 0x1ab   :  { %v187_v59 = vadd.f32 %v186_v57, %v184_v58 }
 0x1ad   :  { %189 = vst.msk [vmem:[%s363_s5] sm:$0xff] %vm188_vm4, %v187_v59 }
 0x1ae   :  { %194 = vsyncpa [#allocation4], 1 }
 0x1af   :  { %195 = vsyncpa [#allocation6], 1 }

</bundles_post_ra>
